<compile_context>
chip_gen: v5e
topology: v5e:2x2
jax: 0.10.0
libtpu: 0.0.40
codegen_flags: <defaults>
</compile_context>

<pallas_src>
import functools

import jax
import jax.numpy as jnp
from jax.experimental import pallas as pl
from jax.experimental.pallas import tpu as pltpu


def _round_up(x, m):
    return ((x + m - 1) // m) * m


def _contrastive_tile_kernel(row_lab_ref, col_lab_ref, row_emb_ref, col_emb_ref,
                             out_ref, *, margin, mxu_dtype, has_padding):
    i = pl.program_id(0)          # row tile (parallel axis)
    j = pl.program_id(1)          # col tile (reduction axis)

    # The output block for row tile i is resident across all j (index map
    # ignores j), so it doubles as the accumulator (P3 pattern).
    @pl.when(j == 0)
    def _init():
        out_ref[...] = jnp.zeros_like(out_ref)

    # F.normalize(x, dim=1) with eps=1e-12:  x * rsqrt(max(||x||^2, eps^2)).
    xr = row_emb_ref[...].astype(jnp.float32)                      # (tm, D)
    xc = col_emb_ref[...].astype(jnp.float32)                      # (tn, D)
    xr = xr * jax.lax.rsqrt(jnp.maximum(jnp.sum(xr * xr, axis=1, keepdims=True), 1e-24))
    xc = xc * jax.lax.rsqrt(jnp.maximum(jnp.sum(xc * xc, axis=1, keepdims=True), 1e-24))

    # Gram tile on the MXU (A @ B^T by contracting the last dim of both
    # operands), bf16 operands for the fast MXU path, f32 accumulation.
    gram = jax.lax.dot_general(
        xr.astype(mxu_dtype), xc.astype(mxu_dtype),
        dimension_numbers=(((1,), (1,)), ((), ())),
        preferred_element_type=jnp.float32)                        # (tm, tn)

    # Unit-norm rows:  ||a - b||^2 = 2 - 2<a, b>.
    d2 = jnp.maximum(2.0 - 2.0 * gram, 0.0)
    dist = jnp.sqrt(d2)

    row_lab = row_lab_ref[...]                                     # (tm, 1) int32
    col_lab = col_lab_ref[...]                                     # (1, tn) int32
    same = row_lab == col_lab                                      # (tm, tn) bool

    if has_padding:
        # Padded rows carry label -1; drop every pair touching one.
        valid = jnp.logical_and(row_lab >= 0, col_lab >= 0)
        pos_mask = jnp.logical_and(same, valid)
        neg_mask = jnp.logical_and(jnp.logical_not(same), valid)
    else:
        pos_mask = same
        neg_mask = jnp.logical_not(same)

    # Negative (hinge) term — the diagonal is excluded automatically because
    # same[r, r] is always True.
    neg_tile = jnp.sum(jnp.where(neg_mask, jnp.maximum(margin - dist, 0.0), 0.0))
    out_ref[0, 1:2, :] = out_ref[0, 1:2, :] + neg_tile

    # Positive term — the diagonal must be excluded explicitly (the MXU/bf16
    # diagonal of gram is only ~1, so dist[r, r] is not exactly 0).  Only
    # diagonal-crossing tiles (i == j, since tm == tn) pay for the iota masks.
    @pl.when(i != j)
    def _offdiag_tile():
        pos_tile = jnp.sum(jnp.where(pos_mask, dist, 0.0))
        out_ref[0, 0:1, :] = out_ref[0, 0:1, :] + pos_tile

    @pl.when(i == j)
    def _diag_tile():
        tm, tn = dist.shape
        r_idx = jax.lax.broadcasted_iota(jnp.int32, (tm, tn), 0)
        c_idx = jax.lax.broadcasted_iota(jnp.int32, (tm, tn), 1)
        mask = jnp.logical_and(pos_mask, r_idx != c_idx)
        pos_tile = jnp.sum(jnp.where(mask, dist, 0.0))
        out_ref[0, 0:1, :] = out_ref[0, 0:1, :] + pos_tile


def _default_vmem_limit_bytes():
    # 64 MiB is safe on v5e/v6e (128 MiB VMEM); cap to 3/4 of physical on v7x
    # (64 MiB per TensorCore).
    try:
        cap = int(pltpu.get_tpu_info().vmem_capacity_bytes)
    except Exception:
        cap = 128 * 1024 * 1024
    return min(64 * 1024 * 1024, (3 * cap) // 4)


def contrastive_loss(embeddings, labels, *, margin=2.0, temperature=0.07,
                     block_size=None, use_bf16_gram=True, num_classes=2):
    """Pallas version of ContrastiveLoss.forward.

    Args:
      embeddings: [B, D] float array (f32 or bf16).
      labels:     [B] binary labels (0 benign / 1 malicious).
    Returns:
      scalar float32 loss.
    """
    del temperature  # unused by the PyTorch forward as well
    B, D = embeddings.shape
    LANE, SUB = 128, 8

    # ---- tiling / padding choices --------------------------------------
    D_pad = _round_up(max(D, LANE), LANE)            # lane-align the embedding dim
    if block_size is None:
        block_size = 512 if B > 512 else B           # 512-wide tiles ~ roofline sweet spot
    tile = _round_up(max(block_size, SUB), SUB)
    if tile < B:
        # Multi-tile: the column-label block puts `tile` on the lane axis, so
        # it must be 128-aligned (a single full-size block needs no alignment).
        tile = _round_up(tile, LANE)
    B_pad = _round_up(B, tile)
    n_tiles = B_pad // tile
    has_padding = B_pad != B

    emb = embeddings
    if B_pad != B or D_pad != D:
        emb = jnp.pad(emb, ((0, B_pad - B), (0, D_pad - D)))

    lab = labels.astype(jnp.int32)
    lab_p = jnp.pad(lab, (0, B_pad - B), constant_values=-1)   # -1 marks padded rows
    row_labels = lab_p.reshape(B_pad, 1)
    col_labels = lab_p.reshape(1, B_pad)

    mxu_dtype = (jnp.bfloat16
                 if (use_bf16_gram or embeddings.dtype == jnp.bfloat16)
                 else jnp.float32)

    kernel = functools.partial(
        _contrastive_tile_kernel, margin=float(margin),
        mxu_dtype=mxu_dtype, has_padding=has_padding)

    partials = pl.pallas_call(
        kernel,
        out_shape=jax.ShapeDtypeStruct((n_tiles, 2, 128), jnp.float32),
        grid_spec=pltpu.PrefetchScalarGridSpec(
            num_scalar_prefetch=0,
            grid=(n_tiles, n_tiles),
            in_specs=[
                pl.BlockSpec((tile, 1), lambda i, j: (i, 0)),       # row labels
                pl.BlockSpec((1, tile), lambda i, j: (0, j)),       # col labels
                pl.BlockSpec((tile, D_pad), lambda i, j: (i, 0)),   # row embeddings
                pl.BlockSpec((tile, D_pad), lambda i, j: (j, 0)),   # col embeddings
            ],
            out_specs=pl.BlockSpec((1, 2, 128), lambda i, j: (i, 0, 0)),
        ),
        compiler_params=pltpu.CompilerParams(
            dimension_semantics=("parallel", "arbitrary"),
            vmem_limit_bytes=_default_vmem_limit_bytes(),
        ),
    )(row_labels, col_labels, emb, emb)

    pos_sum = jnp.sum(partials[:, 0, 0])
    neg_sum = jnp.sum(partials[:, 1, 0])

    # O(B) pair counts from the labels alone (binary 0/1 labels per the module
    # spec; raise num_classes for more label values).
    counts = jnp.bincount(lab, length=num_classes).astype(jnp.float32)
    n_same = jnp.sum(counts * counts)
    bf = jnp.float32(B)
    pos_count = n_same - bf            # diagonal pairs removed
    neg_count = bf * bf - n_same
    return pos_sum / (pos_count + 1e-8) + neg_sum / (neg_count + 1e-8)


def _reference_loss(embeddings, labels, margin=2.0):
    # Pure-JAX mirror of the PyTorch module (for a correctness check).
    x = embeddings.astype(jnp.float32)
    x = x / jnp.maximum(jnp.linalg.norm(x, axis=1, keepdims=True), 1e-12)
    d2 = jnp.sum((x[:, None, :] - x[None, :, :]) ** 2, axis=-1)
    dist = jnp.sqrt(jnp.maximum(d2, 0.0))
    lab = labels.astype(jnp.float32)[:, None]
    label_matrix = (lab == lab.T).astype(jnp.float32)
    off = 1.0 - jnp.eye(x.shape[0], dtype=jnp.float32)
    pos_mask = label_matrix * off
    pos_loss = jnp.sum(dist * pos_mask) / (jnp.sum(pos_mask) + 1e-8)
    neg_mask = (1.0 - label_matrix) * off
    neg_loss = jnp.sum(jnp.maximum(margin - dist, 0.0) * neg_mask) / (
        jnp.sum(neg_mask) + 1e-8)
    return pos_loss + neg_loss


if __name__ == "__main__":
    key = jax.random.PRNGKey(0)
    k1, k2, k3, k4 = jax.random.split(key, 4)

    # Case 1: small single-tile path (default bf16 Gram).
    B, D = 8, 32
    emb = jax.random.normal(k1, (B, D), dtype=jnp.float32)
    lab = jax.random.bernoulli(k2, 0.5, (B,)).astype(jnp.int32)
    loss = jax.block_until_ready(contrastive_loss(emb, lab, margin=2.0, temperature=0.07))
    ref = jax.block_until_ready(_reference_loss(emb, lab, margin=2.0))
    assert jnp.allclose(loss, ref, atol=2e-2, rtol=2e-2), (loss, ref)

    # Case 1b: f32 Gram path, tight tolerance.
    loss32 = jax.block_until_ready(contrastive_loss(emb, lab, use_bf16_gram=False))
    assert jnp.allclose(loss32, ref, atol=1e-3, rtol=1e-3), (loss32, ref)

    # Case 2: multi-tile grid (3x3), batch padding, diagonal-tile gating.
    B2, D2 = 300, 48
    emb2 = jax.random.normal(k3, (B2, D2), dtype=jnp.float32)
    lab2 = jax.random.bernoulli(k4, 0.5, (B2,)).astype(jnp.int32)
    loss2 = jax.block_until_ready(contrastive_loss(emb2, lab2, block_size=128))
    ref2 = jax.block_until_ready(_reference_loss(emb2, lab2, margin=2.0))
    assert jnp.allclose(loss2, ref2, atol=2e-2, rtol=2e-2), (loss2, ref2)

    print("KERNEL_OK")
</pallas_src>

<mosaic_0001>
module attributes {stable_mosaic.version = 11 : i64} {
  func.func @_contrastive_tile_kernel(%arg0: i32, %arg1: i32, %arg2: memref<8x1xi32, #tpu.memory_space<vmem>>, %arg3: memref<1x8xi32, #tpu.memory_space<vmem>>, %arg4: memref<8x128xf32, #tpu.memory_space<vmem>>, %arg5: memref<8x128xf32, #tpu.memory_space<vmem>>, %arg6: memref<1x2x128xf32, #tpu.memory_space<vmem>>) attributes {dimension_semantics = [#tpu.dimension_semantics<parallel>, #tpu.dimension_semantics<arbitrary>], iteration_bounds = array<i64: 1, 1>, scalar_prefetch = 0 : i64, scratch_operands = 0 : i64, tpu.core_type = #tpu.core_type<tc>, window_params = [{transform_indices = @transform_0, window_bounds = array<i64: 8, 1>}, {transform_indices = @transform_1, window_bounds = array<i64: 1, 8>}, {transform_indices = @transform_2, window_bounds = array<i64: 8, 128>}, {transform_indices = @transform_3, window_bounds = array<i64: 8, 128>}, {transform_indices = @transform_4, window_bounds = array<i64: 1, 2, 128>}]} {
    %c0_i32 = arith.constant 0 : i32
    %0 = arith.cmpi eq, %arg1, %c0_i32 : i32
    %1 = arith.extui %0 : i1 to i32
    %c0_i32_0 = arith.constant 0 : i32
    %2 = arith.cmpi ne, %1, %c0_i32_0 : i32
    scf.if %2 {
      %cst_27 = arith.constant 0.000000e+00 : f32
      %60 = vector.broadcast %cst_27 : f32 to vector<1x2x128xf32>
      %c0_28 = arith.constant 0 : index
      %c0_29 = arith.constant 0 : index
      %c0_30 = arith.constant 0 : index
      %61 = vector.load %arg6[%c0_28, %c0_29, %c0_30] : memref<1x2x128xf32, #tpu.memory_space<vmem>>, vector<1x2x128xf32>
      tpu.vector_store %arg6[%c0_28, %c0_29, %c0_30], %60 {strides = array<i32>} : memref<1x2x128xf32, #tpu.memory_space<vmem>>, vector<1x2x128xf32>,
    } else {
    }
    %c0 = arith.constant 0 : index
    %c0_1 = arith.constant 0 : index
    %3 = vector.load %arg4[%c0, %c0_1] : memref<8x128xf32, #tpu.memory_space<vmem>>, vector<8x128xf32>
    %c0_2 = arith.constant 0 : index
    %c0_3 = arith.constant 0 : index
    %4 = vector.load %arg5[%c0_2, %c0_3] : memref<8x128xf32, #tpu.memory_space<vmem>>, vector<8x128xf32>
    %5 = arith.mulf %3, %3 : vector<8x128xf32>
    %cst = arith.constant dense<0.000000e+00> : vector<8xf32>
    %6 = vector.multi_reduction <add>, %5, %cst [1] : vector<8x128xf32> to vector<8xf32>
    %7 = vector.shape_cast %6 : vector<8xf32> to vector<8x1xf32>
    %cst_4 = arith.constant 1.000000e-24 : f32
    %8 = vector.broadcast %cst_4 : f32 to vector<8x1xf32>
    %9 = arith.maximumf %7, %8 : vector<8x1xf32>
    %10 = math.rsqrt %9 : vector<8x1xf32>
    %11 = vector.broadcast %10 : vector<8x1xf32> to vector<8x128xf32>
    %12 = arith.mulf %3, %11 : vector<8x128xf32>
    %13 = arith.mulf %4, %4 : vector<8x128xf32>
    %cst_5 = arith.constant dense<0.000000e+00> : vector<8xf32>
    %14 = vector.multi_reduction <add>, %13, %cst_5 [1] : vector<8x128xf32> to vector<8xf32>
    %15 = vector.shape_cast %14 : vector<8xf32> to vector<8x1xf32>
    %cst_6 = arith.constant 1.000000e-24 : f32
    %16 = vector.broadcast %cst_6 : f32 to vector<8x1xf32>
    %17 = arith.maximumf %15, %16 : vector<8x1xf32>
    %18 = math.rsqrt %17 : vector<8x1xf32>
    %19 = vector.broadcast %18 : vector<8x1xf32> to vector<8x128xf32>
    %20 = arith.mulf %4, %19 : vector<8x128xf32>
    %21 = arith.truncf %12 : vector<8x128xf32> to vector<8x128xbf16>
    %22 = arith.truncf %20 : vector<8x128xf32> to vector<8x128xbf16>
    %cst_7 = arith.constant dense<0.000000e+00> : vector<8x8xf32>
    %23 = tpu.matmul %21, %22, %cst_7 {dimension_numbers = #tpu.dot_dimension_numbers<[1], [1], [0], [0], [0, 0, 1, 0], [], []>} : vector<8x128xbf16>, vector<8x128xbf16>, vector<8x8xf32> -> vector<8x8xf32>
    %cst_8 = arith.constant 2.000000e+00 : f32
    %24 = vector.broadcast %cst_8 : f32 to vector<8x8xf32>
    %25 = arith.mulf %24, %23 : vector<8x8xf32>
    %cst_9 = arith.constant 2.000000e+00 : f32
    %26 = vector.broadcast %cst_9 : f32 to vector<8x8xf32>
    %27 = arith.subf %26, %25 : vector<8x8xf32>
    %cst_10 = arith.constant 0.000000e+00 : f32
    %28 = vector.broadcast %cst_10 : f32 to vector<8x8xf32>
    %29 = arith.maximumf %27, %28 : vector<8x8xf32>
    %30 = math.sqrt %29 : vector<8x8xf32>
    %c0_11 = arith.constant 0 : index
    %c0_12 = arith.constant 0 : index
    %31 = vector.load %arg2[%c0_11, %c0_12] : memref<8x1xi32, #tpu.memory_space<vmem>>, vector<8x1xi32>
    %c0_13 = arith.constant 0 : index
    %c0_14 = arith.constant 0 : index
    %32 = vector.load %arg3[%c0_13, %c0_14] : memref<1x8xi32, #tpu.memory_space<vmem>>, vector<1x8xi32>
    %33 = vector.broadcast %31 : vector<8x1xi32> to vector<8x8xi32>
    %34 = vector.broadcast %32 : vector<1x8xi32> to vector<8x8xi32>
    %35 = arith.cmpi eq, %33, %34 : vector<8x8xi32>
    %cst_15 = arith.constant dense<true> : vector<8x8xi1>
    %36 = arith.xori %35, %cst_15 : vector<8x8xi1>
    %cst_16 = arith.constant 2.000000e+00 : f32
    %37 = vector.broadcast %cst_16 : f32 to vector<8x8xf32>
    %38 = arith.subf %37, %30 : vector<8x8xf32>
    %cst_17 = arith.constant 0.000000e+00 : f32
    %39 = vector.broadcast %cst_17 : f32 to vector<8x8xf32>
    %40 = arith.maximumf %38, %39 : vector<8x8xf32>
    %cst_18 = arith.constant 0.000000e+00 : f32
    %41 = vector.broadcast %cst_18 : f32 to vector<8x8xf32>
    %42 = arith.select %36, %40, %41 : vector<8x8xi1>, vector<8x8xf32>
    %43 = vector.shape_cast %42 : vector<8x8xf32> to vector<1x8x8xf32>
    %cst_19 = arith.constant dense<0.000000e+00> : vector<1xf32>
    %44 = vector.multi_reduction <add>, %43, %cst_19 [1, 2] : vector<1x8x8xf32> to vector<1xf32>
    %45 = vector.shape_cast %44 : vector<1xf32> to vector<1x1x1xf32>
    %46 = vector.extract %45[0, 0, 0] : f32 from vector<1x1x1xf32>
    %c0_20 = arith.constant 0 : index
    %c1 = arith.constant 1 : index
    %c0_21 = arith.constant 0 : index
    %47 = vector.load %arg6[%c0_20, %c1, %c0_21] : memref<1x2x128xf32, #tpu.memory_space<vmem>>, vector<1x1x128xf32>
    %48 = vector.shape_cast %47 : vector<1x1x128xf32> to vector<1x128xf32>
    %49 = vector.broadcast %46 : f32 to vector<1x128xf32>
    %50 = arith.addf %48, %49 : vector<1x128xf32>
    %c0_22 = arith.constant 0 : index
    %c1_23 = arith.constant 1 : index
    %c0_24 = arith.constant 0 : index
    %51 = vector.load %arg6[%c0_22, %c1_23, %c0_24] : memref<1x2x128xf32, #tpu.memory_space<vmem>>, vector<1x1x128xf32>
    %52 = vector.shape_cast %51 : vector<1x1x128xf32> to vector<1x128xf32>
    %53 = vector.shape_cast %50 : vector<1x128xf32> to vector<1x1x128xf32>
    tpu.vector_store %arg6[%c0_22, %c1_23, %c0_24], %53 {strides = array<i32>} : memref<1x2x128xf32, #tpu.memory_space<vmem>>, vector<1x1x128xf32>,
    %54 = arith.cmpi ne, %arg0, %arg1 : i32
    %55 = arith.extui %54 : i1 to i32
    %c0_i32_25 = arith.constant 0 : i32
    %56 = arith.cmpi ne, %55, %c0_i32_25 : i32
    scf.if %56 {
      %cst_27 = arith.constant 0.000000e+00 : f32
      %60 = vector.broadcast %cst_27 : f32 to vector<8x8xf32>
      %61 = arith.select %35, %30, %60 : vector<8x8xi1>, vector<8x8xf32>
      %62 = vector.shape_cast %61 : vector<8x8xf32> to vector<1x8x8xf32>
      %cst_28 = arith.constant dense<0.000000e+00> : vector<1xf32>
      %63 = vector.multi_reduction <add>, %62, %cst_28 [1, 2] : vector<1x8x8xf32> to vector<1xf32>
      %64 = vector.shape_cast %63 : vector<1xf32> to vector<1x1x1xf32>
      %65 = vector.extract %64[0, 0, 0] : f32 from vector<1x1x1xf32>
      %c0_29 = arith.constant 0 : index
      %c0_30 = arith.constant 0 : index
      %c0_31 = arith.constant 0 : index
      %66 = vector.load %arg6[%c0_29, %c0_30, %c0_31] : memref<1x2x128xf32, #tpu.memory_space<vmem>>, vector<1x1x128xf32>
      %67 = vector.shape_cast %66 : vector<1x1x128xf32> to vector<1x128xf32>
      %68 = vector.broadcast %65 : f32 to vector<1x128xf32>
      %69 = arith.addf %67, %68 : vector<1x128xf32>
      %c0_32 = arith.constant 0 : index
      %c0_33 = arith.constant 0 : index
      %c0_34 = arith.constant 0 : index
      %70 = vector.load %arg6[%c0_32, %c0_33, %c0_34] : memref<1x2x128xf32, #tpu.memory_space<vmem>>, vector<1x1x128xf32>
      %71 = vector.shape_cast %70 : vector<1x1x128xf32> to vector<1x128xf32>
      %72 = vector.shape_cast %69 : vector<1x128xf32> to vector<1x1x128xf32>
      tpu.vector_store %arg6[%c0_32, %c0_33, %c0_34], %72 {strides = array<i32>} : memref<1x2x128xf32, #tpu.memory_space<vmem>>, vector<1x1x128xf32>,
    } else {
    }
    %57 = arith.cmpi eq, %arg0, %arg1 : i32
    %58 = arith.extui %57 : i1 to i32
    %c0_i32_26 = arith.constant 0 : i32
    %59 = arith.cmpi ne, %58, %c0_i32_26 : i32
    scf.if %59 {
      %60 = tpu.iota {dimensions = array<i32: 0>} : vector<8x8xi32>
      %61 = tpu.iota {dimensions = array<i32: 1>} : vector<8x8xi32>
      %62 = arith.cmpi ne, %60, %61 : vector<8x8xi32>
      %63 = arith.andi %35, %62 : vector<8x8xi1>
      %cst_27 = arith.constant 0.000000e+00 : f32
      %64 = vector.broadcast %cst_27 : f32 to vector<8x8xf32>
      %65 = arith.select %63, %30, %64 : vector<8x8xi1>, vector<8x8xf32>
      %66 = vector.shape_cast %65 : vector<8x8xf32> to vector<1x8x8xf32>
      %cst_28 = arith.constant dense<0.000000e+00> : vector<1xf32>
      %67 = vector.multi_reduction <add>, %66, %cst_28 [1, 2] : vector<1x8x8xf32> to vector<1xf32>
      %68 = vector.shape_cast %67 : vector<1xf32> to vector<1x1x1xf32>
      %69 = vector.extract %68[0, 0, 0] : f32 from vector<1x1x1xf32>
      %c0_29 = arith.constant 0 : index
      %c0_30 = arith.constant 0 : index
      %c0_31 = arith.constant 0 : index
      %70 = vector.load %arg6[%c0_29, %c0_30, %c0_31] : memref<1x2x128xf32, #tpu.memory_space<vmem>>, vector<1x1x128xf32>
      %71 = vector.shape_cast %70 : vector<1x1x128xf32> to vector<1x128xf32>
      %72 = vector.broadcast %69 : f32 to vector<1x128xf32>
      %73 = arith.addf %71, %72 : vector<1x128xf32>
      %c0_32 = arith.constant 0 : index
      %c0_33 = arith.constant 0 : index
      %c0_34 = arith.constant 0 : index
      %74 = vector.load %arg6[%c0_32, %c0_33, %c0_34] : memref<1x2x128xf32, #tpu.memory_space<vmem>>, vector<1x1x128xf32>
      %75 = vector.shape_cast %74 : vector<1x1x128xf32> to vector<1x128xf32>
      %76 = vector.shape_cast %73 : vector<1x128xf32> to vector<1x1x128xf32>
      tpu.vector_store %arg6[%c0_32, %c0_33, %c0_34], %76 {strides = array<i32>} : memref<1x2x128xf32, #tpu.memory_space<vmem>>, vector<1x1x128xf32>,
    } else {
    }
    return
  }
  func.func @transform_0(%arg0: i32, %arg1: i32) -> (i32, i32) {
    %c0_i32 = arith.constant 0 : i32
    %c0_i32_0 = arith.constant 0 : i32
    return %arg0, %c0_i32 : i32, i32
  }
  func.func @transform_1(%arg0: i32, %arg1: i32) -> (i32, i32) {
    %c0_i32 = arith.constant 0 : i32
    %c0_i32_0 = arith.constant 0 : i32
    return %c0_i32, %arg1 : i32, i32
  }
  func.func @transform_2(%arg0: i32, %arg1: i32) -> (i32, i32) {
    %c0_i32 = arith.constant 0 : i32
    %c0_i32_0 = arith.constant 0 : i32
    return %arg0, %c0_i32 : i32, i32
  }
  func.func @transform_3(%arg0: i32, %arg1: i32) -> (i32, i32) {
    %c0_i32 = arith.constant 0 : i32
    %c0_i32_0 = arith.constant 0 : i32
    return %arg1, %c0_i32 : i32, i32
  }
  func.func @transform_4(%arg0: i32, %arg1: i32) -> (i32, i32, i32) {
    %c0_i32 = arith.constant 0 : i32
    %c0_i32_0 = arith.constant 0 : i32
    %c0_i32_1 = arith.constant 0 : i32
    return %arg0, %c0_i32, %c0_i32_0 : i32, i32, i32
  }
}

</mosaic_0001>

<bundles_post_ra>
// kernel: tpu_custom_call.1
= control target key start
LH: loop header
LB: loop body
LE: loop exit
PB: predicated region body
PF: predicated region fallthrough
CT: control target
= control target key end

     0   :  { %9 = vsyncpa [#allocation3], 0  ;;  %s302_s0 = inlined_call_operand.vmem [shape: s32[8,1], index: 0, kind: input, shape index: {}]   ;;  %s303_s1 = inlined_call_operand.vmem [shape: s32[1,8], index: 1, kind: input, shape index: {}]   ;;  %s304_s2 = inlined_call_operand.vmem [shape: f32[8,128], index: 2, kind: input, shape index: {}]   ;;  %s305_s3 = inlined_call_operand.hbm [shape: f32[8,128], index: 3, kind: input, shape index: {}]   ;;  %s306_s4 = inlined_call_operand.hbm [shape: f32[1,2,128], index: 4, kind: output, shape index: {}]  }
   0x1   :  { %10 = vsyncpa [#allocation4], 0  ;;  %s22_s17 = sshll.u32 %s305_s3, 4  ;;  %s257_s18 = smov [#allocation2]   ;;  %s23_s17 = int_to_ptr.hbm [resolvable:$true] %s22_s17 }
   0x2   :  { %s24_s19 = sshll.u32 %s257_s18, 4  ;;  %s25_s19 = int_to_ptr.vmem [resolvable:$true] %s24_s19 }
   0x3   :  { %27 = dma.hbm_to_vmem [thread:$0]  %s23_s17, 128, %s25_s19, [#allocation3]  }
   0x4   :  { %253 = dma.done.wait [#allocation3], 128  }
   0x5   :  { %254 = vsyncadd [#allocation3], 4294967168  ;;  %v258_v0 = vmov 0.0   ;;  %v39_v1 = vld [vmem:[#allocation2] sm:$0xff]  ;;  %v259_v8 = vmov 0   ;;  %v149_v35 = vlaneseq  ;;  %vm111_vm11 = vcmask 64512  }
   0x6   :  { %37 = vst [vmem:[#allocation5] sm:$0x3] %v258_v0  ;;  %v55_v2 = vmul.f32 %v39_v1, %v39_v1  ;;  %v38_v3 = vld [vmem:[%s304_s2] sm:$0xff]  ;;  %196 = vset.pattern.permute.xlu1 %v259_v8  ;;  %197 = vset.pattern.permute.xlu0 %v259_v8  ;;  %vm260_vm12 = vmmov 1   ;;  %s177_s27 = sshll.u32 %s306_s4, 4  ;;  %s178_s27 = int_to_ptr.hbm [resolvable:$true] %s177_s27 }
   0x7   :  { %v40_v4 = vmul.f32 %v38_v3, %v38_v3  ;;  %v100_v7 = vld [vmem:[%s302_s0] sm:$0xff]  ;;  %v150_v39 = vshrl.u32 %v149_v35, 7  ;;  %v152_v40 = vand.u32 127, %v149_v35 }
   0x8   :  { %56 = vadd.xlane.f32.xlu0 %v55_v2  ;;  %103 = vperm.xlu1 %196, %v100_v7   ;;  %v198_v38 = vld [vmem:[%s303_s1] ss:$0 sm:$0xff]  ;;  %s261_s1 = smov [#allocation5]  }
   0x9   :  { %vm153_vm6 = vcmp.ne.s32.totalorder %v150_v39, %v152_v40  ;;  %s175_s23 = sshll.u32 %s261_s1, 4  ;;  %s176_s23 = int_to_ptr.vmem [resolvable:$true] %s175_s23 }
  0x10   :  { %41 = vadd.xlane.f32.xlu0 %v40_v4 }
  0x7a   :  { %v104_v42 = vpop.permute.xlu1 %103 }
  0x7b   :  { %v57_v5 = vpop.xlane.xlu0 %56  ;;  %vm106_vm7 = vcmp.eq.s32.totalorder %v104_v42, %v198_v38 }
  0x7c   :  { %v58_v6 = vmax.f32 %v57_v5, 1e-24  ;;  %vm154_vm8 = vmand %vm106_vm7, %vm153_vm6  ;;  %v122_v5 = vld [vmem:[#allocation5 + $0x1] sm:$0x1] }
  0x7d   :  { %vm107_vm13 = vmxor %vm106_vm7, %vm260_vm12 }
  0x7e   :  { %199 = vrsqrt.f32 %v58_v6  ;;  %vm65_vm1 = vweird.f32 %v58_v6 }
  0x83   :  { %v42_v9 = vpop.xlane.xlu0 %41 }
  0x84   :  { %v200_v10 = vpop.eup %199  ;;  %v43_v11 = vmax.f32 %v42_v9, 1e-24 }
  0x85   :  { %v60_v12 = vmul.f32 %v200_v10, %v58_v6  ;;  %vm66_vm0 = vweird.f32 %v200_v10  ;;  %v166_v6 = vld [vmem:[#allocation5] sm:$0x1] }
  0x86   :  { %201 = vrsqrt.f32 %v43_v11  ;;  %vm67_vm2 = vmor %vm65_vm1, %vm66_vm0  ;;  %vm50_vm4 = vweird.f32 %v43_v11 }
  0x87   :  { %v61_v13 = vmul.f32 %v200_v10, %v60_v12 }
  0x89   :  { %v62_v14 = vmul.f32 0.5, %v61_v13 }
  0x8b   :  { %v63_v15 = vsub.f32 1.5, %v62_v14 }
  0x8c   :  { %v202_v16 = vpop.eup %201 }
  0x8d   :  { %v45_v17 = vmul.f32 %v202_v16, %v43_v11  ;;  %v64_v18 = vmul.f32 %v200_v10, %v63_v15  ;;  %vm51_vm3 = vweird.f32 %v202_v16 }
  0x8e   :  { %vm52_vm5 = vmor %vm50_vm4, %vm51_vm3 }
  0x8f   :  { %v46_v19 = vmul.f32 %v202_v16, %v45_v17  ;;  %v68_v20 = vsel %vm67_vm2, %v200_v10, %v64_v18 }
  0x90   :  { %v69_v21 = vmul.f32 %v68_v20, %v39_v1 }
  0x91   :  { %v47_v22 = vmul.f32 0.5, %v46_v19 }
  0x92   :  { %v71_v23 = vpack.c.bf16 %v69_v21, %v69_v21 }
  0x93   :  { %v48_v24 = vsub.f32 1.5, %v47_v22 }
  0x94   :  { %79 = vmatpush.bf16.xpose.msra.mxu0 %v71_v23 }
  0x95   :  { %v49_v25 = vmul.f32 %v202_v16, %v48_v24 }
  0x97   :  { %v53_v26 = vsel %vm52_vm5, %v202_v16, %v49_v25 }
  0x98   :  { %v54_v27 = vmul.f32 %v53_v26, %v38_v3 }
  0x9a   :  { %v70_v28 = vpack.c.bf16 %v54_v27, %v54_v27 }
  0x9c   :  { %80 = vmatmul.bf16.vlgmr.msra.gmra.mxu0 %v70_v28 }
 0x119   :  { %v81_v29 = vpop.f32.mrf.mxu0 }
 0x11a   :  { %v85_v30 = vmul.f32 2.0, %v81_v29 }
 0x11c   :  { %v86_v31 = vsub.f32 2.0, %v85_v30 }
 0x11e   :  { %v87_v32 = vmax.f32 %v86_v31, 0.0 }
 0x120   :  { %203 = vrsqrt.f32 %v87_v32  ;;  %vm95_vm9 = vcmp.eq.f32.partialorder %v87_v32, inf  ;;  %v98_v46 = vand.u32 2147483648, %v87_v32  ;;  %vm97_vm10 = vcmp.eq.f32.partialorder %v87_v32, 0.0 }
 0x121   :  { %v83_v33 = vpop.f32.mrf.mxu0 }
 0x126   :  { %v204_v34 = vpop.eup %203 }
 0x127   :  { %v89_v36 = vmul.f32 %v204_v34, %v87_v32 }
 0x129   :  { %v90_v37 = vmul.f32 %v204_v34, %v89_v36 }
 0x12b   :  { %v91_v41 = vmul.f32 0.5, %v90_v37 }
 0x12d   :  { %v92_v43 = vsub.f32 1.5, %v91_v41 }
 0x12f   :  { %v93_v44 = vmul.f32 %v204_v34, %v92_v43 }
 0x131   :  { %v94_v45 = vmul.f32 %v93_v44, %v87_v32 }
 0x133   :  { %v96_v47 = vsel %vm95_vm9, %v87_v32, %v94_v45 }
 0x134   :  { %v99_v48 = vsel %vm97_vm10, %v98_v46, %v96_v47 }
 0x135   :  { %v155_v49 = vsel %vm154_vm8, %v99_v48, 0.0  ;;  %v108_v50 = vsub.f32 2.0, %v99_v48 }
 0x136   :  { %v156_v51 = vsel %vm111_vm11, %v155_v49, 0.0 }
 0x137   :  { %157 = vadd.xlane.f32.xlu2 %v156_v51  ;;  %v109_v52 = vmax.f32 %v108_v50, 0.0 }
 0x139   :  { %v110_v53 = vsel %vm107_vm13, %v109_v52, 0.0 }
 0x13a   :  { %v112_v54 = vsel %vm111_vm11, %v110_v53, 0.0 }
 0x13b   :  { %113 = vadd.xlane.f32.xlu1 %v112_v54 }
 0x1aa   :  { %v158_v55 = vpop.xlane.xlu2 %157 }
 0x1ab   :  { %v159_v56 = vrot.slane %v158_v55, 4 }
 0x1ad   :  { %v160_v57 = vadd.f32 %v159_v56, %v158_v55 }
 0x1ae   :  { %v114_v58 = vpop.xlane.xlu1 %113 }
 0x1af   :  { %v161_v59 = vrot.slane %v160_v57, 2  ;;  %v115_v60 = vrot.slane %v114_v58, 4 }
 0x1b1   :  { %v116_v61 = vadd.f32 %v115_v60, %v114_v58  ;;  %v162_v62 = vadd.f32 %v161_v59, %v160_v57 }
 0x1b3   :  { %v117_v63 = vrot.slane %v116_v61, 2  ;;  %v163_v1 = vrot.slane %v162_v62, 1 }
 0x1b5   :  { %v118_v0 = vadd.f32 %v117_v63, %v116_v61  ;;  %v164_v4 = vadd.f32 %v163_v1, %v162_v62 }
 0x1b7   :  { %v119_v2 = vrot.slane %v118_v0, 1 }
 0x1b9   :  { %v120_v3 = vadd.f32 %v119_v2, %v118_v0 }
 0x1bb   :  { %187 = vpush %v120_v3 }
 0x1bc   :  { %189 = vpush %v164_v4 }
 0x1ec   :  { %s188_s24 = spop %187 }
 0x1ed   :  { %v123_v7 = vstv %s188_s24  ;;  %s190_s28 = spop %189 }
 0x1ee   :  { %v124_v8 = vadd.f32 %v123_v7, %v122_v5  ;;  %v167_v9 = vstv %s190_s28 }
 0x1ef   :  { %v168_v10 = vadd.f32 %v167_v9, %v166_v6 }
 0x1f0   :  { %125 = vst [vmem:[#allocation5 + $0x1] sm:$0x1] %v124_v8 }
 0x1f1   :  { %169 = vst [vmem:[#allocation5] sm:$0x1] %v168_v10 }
 0x1f2   :  { %180 = dma.vmem_to_hbm [thread:$0]  %s176_s23, 32, %s178_s27, [#allocation4]  }
 0x1f3   :  { %255 = dma.done.wait [#allocation4], 32  }
 0x1f4   :  { %256 = vsyncadd [#allocation4], 4294967264 }
 0x1f5   :  { %185 = vsyncpa [#allocation3], 1 }
 0x1f6   :  { %186 = vsyncpa [#allocation4], 1 }

</bundles_post_ra>
